<compile_context>
chip_gen: v5e
topology: v5e:2x2
jax: 0.10.0
libtpu: 0.0.40
codegen_flags: <defaults>
</compile_context>

<pallas_src>
import functools

import jax
import jax.numpy as jnp
from jax.experimental import pallas as pl
from jax.experimental.pallas import tpu as pltpu


def _cdiv(a, b):
    return -(-a // b)


def _combo_stats_kernel(x_ref, t_ref, *out_refs,
                        hw, tile, tiles_per_slice,
                        alpha, gamma, bce_weight, focal_weight,
                        use_dice, use_bce, use_focal, needs_mask):
    p = pl.program_id(0)
    k = pl.program_id(1)
    use_pixel = use_bce or use_focal

    # Zero the per-slice, VMEM-resident accumulators (output blocks) once.
    @pl.when(k == 0)
    def _init():
        for r in out_refs:
            r[...] = jnp.zeros_like(r)

    x = x_ref[...].astype(jnp.float32)   # (N, T) logits
    t = t_ref[...].astype(jnp.float32)   # (N, T) targets in {0, 1}

    if needs_mask:
        col = ((p * tiles_per_slice + k) * tile
               + jax.lax.broadcasted_iota(jnp.int32, x.shape, 1))
        valid = (col < hw).astype(jnp.float32)
        mask = lambda v: v * valid
    else:
        mask = lambda v: v

    # --- shared transcendental chain: one exp, one log1p, one reciprocal ---
    e = jnp.exp(-jnp.abs(x))
    if use_pixel:
        # stable BCE-with-logits: max(x,0) - x*t + log(1 + exp(-|x|))
        bce = jnp.maximum(x, 0.0) - x * t + jnp.log1p(e)
    if use_dice or use_focal:
        r = pl.reciprocal(1.0 + e, approx=False)
        probs = jnp.where(x >= 0.0, r, e * r)          # == sigmoid(x), stable

    idx = 0
    if use_dice:
        inter_ref, denom_ref = out_refs[0], out_refs[1]
        idx = 2
        inter_ref[...] += mask(probs * t)[None]
        denom_ref[...] += mask(probs + t)[None]

    if use_pixel:
        pixel_ref = out_refs[idx]
        pix = bce_weight * bce if use_bce else None
        if use_focal:
            # Hard {0,1} targets (per FocalLoss spec): pt == t*p + (1-t)*(1-p)
            # == exp(-bce); computed from the shared sigmoid instead of a
            # second per-element exp on the single EUP slot.
            pt = t * probs + (1.0 - t) * (1.0 - probs)
            base = jnp.maximum(1.0 - pt, 0.0)          # clamp: no NaN from pow
            g = float(gamma)
            if g == int(g) and 0 <= int(g) <= 4:
                pw = jnp.ones_like(base)
                for _ in range(int(g)):                # gamma=2 -> two VPU muls
                    pw = pw * base
            else:
                pw = base ** g
            alpha_t = alpha * t + (1.0 - alpha) * (1.0 - t)
            focal = alpha_t * pw * bce
            pix = focal_weight * focal if pix is None else pix + focal_weight * focal
        pixel_ref[...] += mask(pix)[None]


def combination_loss(logits, targets,
                     dice_weight=0.5, focal_weight=0.0, bce_weight=0.5,
                     alpha=0.25, gamma=2.0, smooth=1.0,
                     max_tile=2048):
    """JAX/Pallas equivalent of CombinationLoss.forward."""
    # Weights must be Python numbers (mirrors the nn.Module's `if self.weight:`
    # gating); traced-array weights would not work there either.
    dice_weight = float(dice_weight)
    focal_weight = float(focal_weight)
    bce_weight = float(bce_weight)
    use_dice = bool(dice_weight)
    use_focal = bool(focal_weight)
    use_bce = bool(bce_weight)
    use_pixel = use_bce or use_focal
    if not (use_dice or use_pixel):
        return jnp.float32(0.0)

    n = logits.shape[0]
    x = logits.reshape(n, -1)                    # keep native dtype (bf16 ok)
    t = targets.reshape(n, -1)
    if not jnp.issubdtype(t.dtype, jnp.floating):
        t = t.astype(jnp.float32)                # mirrors targets.float()
    hw = x.shape[1]

    n_stats = (2 if use_dice else 0) + (1 if use_pixel else 0)

    # --- pick a lane tile that fits comfortably in scoped VMEM on all gens ---
    hw128 = _cdiv(hw, 128) * 128
    tile = min(hw128, int(max_tile))

    def _working_set(tl):
        inputs = 2 * n * tl * (x.dtype.itemsize + t.dtype.itemsize)  # 2x buffered
        outputs = 2 * n_stats * n * tl * 4                           # f32 stat blocks
        return inputs + outputs

    budget = 10 * 1024 * 1024                    # < v5e's 16 MiB default scoped VMEM
    while tile > 128 and _working_set(tile) > budget:
        tile = max(128, ((tile // 2) // 128) * 128)

    num_tiles = _cdiv(hw, tile)
    num_slices = 2 if num_tiles >= 2 else 1      # feeds both TCs on v7x
    tiles_per_slice = _cdiv(num_tiles, num_slices)
    hw_pad = num_slices * tiles_per_slice * tile
    if hw_pad != hw:
        x = jnp.pad(x, ((0, 0), (0, hw_pad - hw)))
        t = jnp.pad(t, ((0, 0), (0, hw_pad - hw)))

    kernel = functools.partial(
        _combo_stats_kernel,
        hw=hw, tile=tile, tiles_per_slice=tiles_per_slice,
        alpha=float(alpha), gamma=float(gamma),
        bce_weight=bce_weight, focal_weight=focal_weight,
        use_dice=use_dice, use_bce=use_bce, use_focal=use_focal,
        needs_mask=(hw_pad != hw))

    in_spec = pl.BlockSpec((n, tile), lambda p, k: (0, p * tiles_per_slice + k))
    stat_spec = pl.BlockSpec((1, n, tile), lambda p, k: (p, 0, 0))
    stat_shape = jax.ShapeDtypeStruct((num_slices, n, tile), jnp.float32)

    outs = pl.pallas_call(
        kernel,
        grid=(num_slices, tiles_per_slice),
        in_specs=[in_spec, in_spec],
        out_specs=[stat_spec] * n_stats,
        out_shape=[stat_shape] * n_stats,
        compiler_params=pltpu.CompilerParams(
            dimension_semantics=("parallel", "arbitrary")),
    )(x, t)

    # --- tiny final reductions + weighted combination in JAX glue ---
    count = float(n * hw)
    loss = jnp.float32(0.0)
    idx = 0
    if use_dice:
        inter = jnp.sum(outs[0], axis=(0, 2))            # (N,)
        denom = jnp.sum(outs[1], axis=(0, 2))            # (N,)
        idx = 2
        dice_score = (2.0 * inter + smooth) / (denom + smooth)
        loss = loss + jnp.mean(1.0 - dice_score) * dice_weight
    if use_pixel:
        # bce_weight / focal_weight were already applied per element in-kernel;
        # both terms are means over the same N*HW count.
        loss = loss + jnp.sum(outs[idx]) / count
    return loss


def _reference_loss(logits, targets, dice_w, focal_w, bce_w,
                    alpha=0.25, gamma=2.0, smooth=1.0):
    """Pure-JAX reference mirroring the PyTorch module math."""
    n = logits.shape[0]
    x = logits.reshape(n, -1).astype(jnp.float32)
    t = targets.reshape(n, -1).astype(jnp.float32)
    bce = jnp.maximum(x, 0.0) - x * t + jnp.log1p(jnp.exp(-jnp.abs(x)))
    probs = jax.nn.sigmoid(x)
    dice = 1.0 - (2.0 * jnp.sum(probs * t, 1) + smooth) / (
        jnp.sum(probs, 1) + jnp.sum(t, 1) + smooth)
    pt = jnp.exp(-bce)
    focal = (alpha * t + (1.0 - alpha) * (1.0 - t)) \
        * jnp.maximum(1.0 - pt, 0.0) ** gamma * bce
    return (dice_w * jnp.mean(dice)
            + focal_w * jnp.mean(focal)
            + bce_w * jnp.mean(bce))


if __name__ == "__main__":
    key = jax.random.PRNGKey(0)
    k1, k2, k3, k4 = jax.random.split(key, 4)

    # Test 1: module defaults (dice 0.5, focal 0.0, bce 0.5), single-tile path.
    logits1 = jax.random.normal(k1, (2, 1, 16, 16), dtype=jnp.float32)
    targets1 = (jax.random.uniform(k2, (2, 1, 16, 16)) < 0.5).astype(jnp.float32)
    loss1 = combination_loss(logits1, targets1)
    jax.block_until_ready(loss1)
    ref1 = _reference_loss(logits1, targets1, 0.5, 0.0, 0.5)
    assert jnp.allclose(loss1, ref1, rtol=1e-5, atol=1e-5), (loss1, ref1)

    # Test 2: all three terms; multi-tile, parallel-slice and masked-padding path.
    logits2 = jax.random.normal(k3, (2, 1, 48, 40), dtype=jnp.float32)
    targets2 = (jax.random.uniform(k4, (2, 1, 48, 40)) < 0.5).astype(jnp.float32)
    loss2 = combination_loss(logits2, targets2,
                             dice_weight=0.3, focal_weight=0.4, bce_weight=0.3,
                             max_tile=512)
    jax.block_until_ready(loss2)
    ref2 = _reference_loss(logits2, targets2, 0.3, 0.4, 0.3)
    assert jnp.allclose(loss2, ref2, rtol=1e-5, atol=1e-5), (loss2, ref2)

    print("KERNEL_OK")
</pallas_src>

<mosaic_0001>
module attributes {stable_mosaic.version = 11 : i64} {
  func.func @_combo_stats_kernel(%arg0: i32, %arg1: i32, %arg2: memref<2x256xf32, #tpu.memory_space<vmem>>, %arg3: memref<2x256xf32, #tpu.memory_space<vmem>>, %arg4: memref<1x2x256xf32, #tpu.memory_space<vmem>>, %arg5: memref<1x2x256xf32, #tpu.memory_space<vmem>>, %arg6: memref<1x2x256xf32, #tpu.memory_space<vmem>>) attributes {dimension_semantics = [#tpu.dimension_semantics<parallel>, #tpu.dimension_semantics<arbitrary>], iteration_bounds = array<i64: 1, 1>, scalar_prefetch = 0 : i64, scratch_operands = 0 : i64, tpu.core_type = #tpu.core_type<tc>, window_params = [{transform_indices = @transform_0, window_bounds = array<i64: 2, 256>}, {transform_indices = @transform_1, window_bounds = array<i64: 2, 256>}, {transform_indices = @transform_2, window_bounds = array<i64: 1, 2, 256>}, {transform_indices = @transform_3, window_bounds = array<i64: 1, 2, 256>}, {transform_indices = @transform_4, window_bounds = array<i64: 1, 2, 256>}]} {
    %c0_i32 = arith.constant 0 : i32
    %0 = arith.cmpi eq, %arg1, %c0_i32 : i32
    %1 = arith.extui %0 : i1 to i32
    %c0_i32_0 = arith.constant 0 : i32
    %2 = arith.cmpi ne, %1, %c0_i32_0 : i32
    scf.if %2 {
      %cst_26 = arith.constant 0.000000e+00 : f32
      %38 = vector.broadcast %cst_26 : f32 to vector<1x2x256xf32>
      %c0_27 = arith.constant 0 : index
      %c0_28 = arith.constant 0 : index
      %c0_29 = arith.constant 0 : index
      %39 = vector.load %arg4[%c0_27, %c0_28, %c0_29] : memref<1x2x256xf32, #tpu.memory_space<vmem>>, vector<1x2x256xf32>
      tpu.vector_store %arg4[%c0_27, %c0_28, %c0_29], %38 {strides = array<i32>} : memref<1x2x256xf32, #tpu.memory_space<vmem>>, vector<1x2x256xf32>,
      %cst_30 = arith.constant 0.000000e+00 : f32
      %40 = vector.broadcast %cst_30 : f32 to vector<1x2x256xf32>
      %c0_31 = arith.constant 0 : index
      %c0_32 = arith.constant 0 : index
      %c0_33 = arith.constant 0 : index
      %41 = vector.load %arg5[%c0_31, %c0_32, %c0_33] : memref<1x2x256xf32, #tpu.memory_space<vmem>>, vector<1x2x256xf32>
      tpu.vector_store %arg5[%c0_31, %c0_32, %c0_33], %40 {strides = array<i32>} : memref<1x2x256xf32, #tpu.memory_space<vmem>>, vector<1x2x256xf32>,
      %cst_34 = arith.constant 0.000000e+00 : f32
      %42 = vector.broadcast %cst_34 : f32 to vector<1x2x256xf32>
      %c0_35 = arith.constant 0 : index
      %c0_36 = arith.constant 0 : index
      %c0_37 = arith.constant 0 : index
      %43 = vector.load %arg6[%c0_35, %c0_36, %c0_37] : memref<1x2x256xf32, #tpu.memory_space<vmem>>, vector<1x2x256xf32>
      tpu.vector_store %arg6[%c0_35, %c0_36, %c0_37], %42 {strides = array<i32>} : memref<1x2x256xf32, #tpu.memory_space<vmem>>, vector<1x2x256xf32>,
    } else {
    }
    %c0 = arith.constant 0 : index
    %c0_1 = arith.constant 0 : index
    %3 = vector.load %arg2[%c0, %c0_1] : memref<2x256xf32, #tpu.memory_space<vmem>>, vector<2x256xf32>
    %c0_2 = arith.constant 0 : index
    %c0_3 = arith.constant 0 : index
    %4 = vector.load %arg3[%c0_2, %c0_3] : memref<2x256xf32, #tpu.memory_space<vmem>>, vector<2x256xf32>
    %5 = math.absf %3 : vector<2x256xf32>
    %cst = arith.constant 0.000000e+00 : f32
    %6 = vector.broadcast %cst : f32 to vector<2x256xf32>
    %7 = arith.subf %6, %5 : vector<2x256xf32>
    %8 = math.exp %7 : vector<2x256xf32>
    %cst_4 = arith.constant 0.000000e+00 : f32
    %9 = vector.broadcast %cst_4 : f32 to vector<2x256xf32>
    %10 = arith.maximumf %3, %9 : vector<2x256xf32>
    %11 = arith.mulf %3, %4 : vector<2x256xf32>
    %12 = arith.subf %10, %11 : vector<2x256xf32>
    %13 = math.log1p %8 : vector<2x256xf32>
    %14 = arith.addf %12, %13 : vector<2x256xf32>
    %cst_5 = arith.constant 1.000000e+00 : f32
    %15 = vector.broadcast %cst_5 : f32 to vector<2x256xf32>
    %16 = arith.addf %15, %8 : vector<2x256xf32>
    %17 = tpu.reciprocal %16 : vector<2x256xf32> -> vector<2x256xf32>
    %cst_6 = arith.constant 0.000000e+00 : f32
    %18 = vector.broadcast %cst_6 : f32 to vector<2x256xf32>
    %19 = arith.cmpf oge, %3, %18 : vector<2x256xf32>
    %20 = arith.mulf %8, %17 : vector<2x256xf32>
    %21 = arith.select %19, %17, %20 : vector<2x256xi1>, vector<2x256xf32>
    %c0_7 = arith.constant 0 : index
    %c0_8 = arith.constant 0 : index
    %c0_9 = arith.constant 0 : index
    %22 = vector.load %arg4[%c0_7, %c0_8, %c0_9] : memref<1x2x256xf32, #tpu.memory_space<vmem>>, vector<1x2x256xf32>
    %23 = arith.mulf %21, %4 : vector<2x256xf32>
    %24 = vector.shape_cast %23 : vector<2x256xf32> to vector<1x2x256xf32>
    %25 = arith.addf %22, %24 : vector<1x2x256xf32>
    %c0_10 = arith.constant 0 : index
    %c0_11 = arith.constant 0 : index
    %c0_12 = arith.constant 0 : index
    %26 = vector.load %arg4[%c0_10, %c0_11, %c0_12] : memref<1x2x256xf32, #tpu.memory_space<vmem>>, vector<1x2x256xf32>
    tpu.vector_store %arg4[%c0_10, %c0_11, %c0_12], %25 {strides = array<i32>} : memref<1x2x256xf32, #tpu.memory_space<vmem>>, vector<1x2x256xf32>,
    %c0_13 = arith.constant 0 : index
    %c0_14 = arith.constant 0 : index
    %c0_15 = arith.constant 0 : index
    %27 = vector.load %arg5[%c0_13, %c0_14, %c0_15] : memref<1x2x256xf32, #tpu.memory_space<vmem>>, vector<1x2x256xf32>
    %28 = arith.addf %21, %4 : vector<2x256xf32>
    %29 = vector.shape_cast %28 : vector<2x256xf32> to vector<1x2x256xf32>
    %30 = arith.addf %27, %29 : vector<1x2x256xf32>
    %c0_16 = arith.constant 0 : index
    %c0_17 = arith.constant 0 : index
    %c0_18 = arith.constant 0 : index
    %31 = vector.load %arg5[%c0_16, %c0_17, %c0_18] : memref<1x2x256xf32, #tpu.memory_space<vmem>>, vector<1x2x256xf32>
    tpu.vector_store %arg5[%c0_16, %c0_17, %c0_18], %30 {strides = array<i32>} : memref<1x2x256xf32, #tpu.memory_space<vmem>>, vector<1x2x256xf32>,
    %cst_19 = arith.constant 5.000000e-01 : f32
    %32 = vector.broadcast %cst_19 : f32 to vector<2x256xf32>
    %33 = arith.mulf %32, %14 : vector<2x256xf32>
    %c0_20 = arith.constant 0 : index
    %c0_21 = arith.constant 0 : index
    %c0_22 = arith.constant 0 : index
    %34 = vector.load %arg6[%c0_20, %c0_21, %c0_22] : memref<1x2x256xf32, #tpu.memory_space<vmem>>, vector<1x2x256xf32>
    %35 = vector.shape_cast %33 : vector<2x256xf32> to vector<1x2x256xf32>
    %36 = arith.addf %34, %35 : vector<1x2x256xf32>
    %c0_23 = arith.constant 0 : index
    %c0_24 = arith.constant 0 : index
    %c0_25 = arith.constant 0 : index
    %37 = vector.load %arg6[%c0_23, %c0_24, %c0_25] : memref<1x2x256xf32, #tpu.memory_space<vmem>>, vector<1x2x256xf32>
    tpu.vector_store %arg6[%c0_23, %c0_24, %c0_25], %36 {strides = array<i32>} : memref<1x2x256xf32, #tpu.memory_space<vmem>>, vector<1x2x256xf32>,
    return
  }
  func.func @transform_0(%arg0: i32, %arg1: i32) -> (i32, i32) {
    %c1_i32 = arith.constant 1 : i32
    %0 = arith.muli %arg0, %c1_i32 : i32
    %1 = arith.addi %0, %arg1 : i32
    %c0_i32 = arith.constant 0 : i32
    %c0_i32_0 = arith.constant 0 : i32
    return %c0_i32, %1 : i32, i32
  }
  func.func @transform_1(%arg0: i32, %arg1: i32) -> (i32, i32) {
    %c1_i32 = arith.constant 1 : i32
    %0 = arith.muli %arg0, %c1_i32 : i32
    %1 = arith.addi %0, %arg1 : i32
    %c0_i32 = arith.constant 0 : i32
    %c0_i32_0 = arith.constant 0 : i32
    return %c0_i32, %1 : i32, i32
  }
  func.func @transform_2(%arg0: i32, %arg1: i32) -> (i32, i32, i32) {
    %c0_i32 = arith.constant 0 : i32
    %c0_i32_0 = arith.constant 0 : i32
    %c0_i32_1 = arith.constant 0 : i32
    return %arg0, %c0_i32, %c0_i32_0 : i32, i32, i32
  }
  func.func @transform_3(%arg0: i32, %arg1: i32) -> (i32, i32, i32) {
    %c0_i32 = arith.constant 0 : i32
    %c0_i32_0 = arith.constant 0 : i32
    %c0_i32_1 = arith.constant 0 : i32
    return %arg0, %c0_i32, %c0_i32_0 : i32, i32, i32
  }
  func.func @transform_4(%arg0: i32, %arg1: i32) -> (i32, i32, i32) {
    %c0_i32 = arith.constant 0 : i32
    %c0_i32_0 = arith.constant 0 : i32
    %c0_i32_1 = arith.constant 0 : i32
    return %arg0, %c0_i32, %c0_i32_0 : i32, i32, i32
  }
}

</mosaic_0001>

<bundles_post_ra>
// kernel: tpu_custom_call.1
= control target key start
LH: loop header
LB: loop body
LE: loop exit
PB: predicated region body
PF: predicated region fallthrough
CT: control target
= control target key end

     0   :  { %10 = vsyncpa [#allocation3], 0  ;;  %s347_s0 = inlined_call_operand.hbm [shape: f32[2,256], index: 0, kind: input, shape index: {}]   ;;  %s348_s1 = inlined_call_operand.hbm [shape: f32[2,256], index: 1, kind: input, shape index: {}]   ;;  %s349_s2 = inlined_call_operand.hbm [shape: f32[1,2,256], index: 2, kind: output, shape index: {0}]   ;;  %s350_s3 = inlined_call_operand.hbm [shape: f32[1,2,256], index: 3, kind: output, shape index: {1}]   ;;  %s351_s4 = inlined_call_operand.hbm [shape: f32[1,2,256], index: 4, kind: output, shape index: {2}]  }
   0x1   :  { %11 = vsyncpa [#allocation6], 0 }
   0x2   :  { %12 = vsyncpa [#allocation4], 0 }
   0x3   :  { %13 = vsyncpa [#allocation9], 0  ;;  %s23_s17 = sshll.u32 %s347_s0, 4  ;;  %s301_s18 = smov [#allocation2]   ;;  %s24_s17 = int_to_ptr.hbm [resolvable:$true] %s23_s17 }
   0x4   :  { %s25_s19 = sshll.u32 %s301_s18, 4  ;;  %s38_s22 = sshll.u32 %s348_s1, 4  ;;  %s26_s19 = int_to_ptr.vmem [resolvable:$true] %s25_s19  ;;  %s39_s22 = int_to_ptr.hbm [resolvable:$true] %s38_s22 }
   0x5   :  { %28 = dma.hbm_to_vmem [thread:$0]  %s24_s17, 64, %s26_s19, [#allocation3]  }
   0x6   :  { %s302_s23 = smov [#allocation5]  }
   0x7   :  { %s40_s24 = sshll.u32 %s302_s23, 4  ;;  %s41_s24 = int_to_ptr.vmem [resolvable:$true] %s40_s24 }
   0x8   :  { %43 = dma.hbm_to_vmem [thread:$0]  %s39_s22, 64, %s41_s24, [#allocation6]  }
   0x9   :  { %293 = dma.done.wait [#allocation3], 64  }
   0xa   :  { %294 = vsyncadd [#allocation3], 4294967232 }
   0xb   :  { %295 = dma.done.wait [#allocation6], 64  }
   0xc   :  { %296 = vsyncadd [#allocation6], 4294967232  ;;  %v303_v0 = vmov 0.0   ;;  %v63_v1 = vld [vmem:[#allocation2] sm:$0xf]  ;;  %s304_s0 = smov [#allocation8]  }
   0xd   :  { %61 = vst [vmem:[#allocation8] sm:$0xf] %v303_v0  ;;  %v65_v2 = vand.u32 2147483647, %v63_v1  ;;  %v64_v8 = vld [vmem:[#allocation5] sm:$0xf] }
   0xe   :  { %60 = vst [vmem:[#allocation7] sm:$0xf] %v303_v0  ;;  %v69_v10 = vmax.f32 %v63_v1, 0.0  ;;  %v70_v11 = vmul.f32 %v64_v8, %v63_v1  ;;  %vm97_vm5 = vcmp.ge.f32.partialorder %v63_v1, 0.0  ;;  %s128_s1 = sshll.u32 %s304_s0, 4  ;;  %s130_s27 = sshll.u32 %s350_s3, 4  ;;  %s129_s1 = int_to_ptr.vmem [resolvable:$true] %s128_s1  ;;  %s131_s27 = int_to_ptr.hbm [resolvable:$true] %s130_s27 }
   0xf   :  { %62 = vst [vmem:[#allocation10] sm:$0xf] %v303_v0  ;;  %v66_v3 = vsub.f32 0.0, %v65_v2  ;;  %s305_s28 = smov [#allocation7]   ;;  %s119_s6 = sshll.u32 %s349_s2, 4  ;;  %s120_s6 = int_to_ptr.hbm [resolvable:$true] %s119_s6 }
  0x10   :  { %v71_v17 = vsub.f32 %v69_v10, %v70_v11  ;;  %s117_s29 = sshll.u32 %s305_s28, 4  ;;  %s306_s7 = smov [#allocation10]   ;;  %s118_s29 = int_to_ptr.vmem [resolvable:$true] %s117_s29 }
  0x11   :  { %v67_v4 = vmul.f32 1.442695, %v66_v3  ;;  %s139_s8 = sshll.u32 %s306_s7, 4  ;;  %s141_s11 = sshll.u32 %s351_s4, 4  ;;  %s140_s8 = int_to_ptr.vmem [resolvable:$true] %s139_s8  ;;  %s142_s11 = int_to_ptr.hbm [resolvable:$true] %s141_s11 }
  0x13   :  { %167 = vpow2.f32 %v67_v4 }
  0x14   :  { %v104_v34 = vld [vmem:[#allocation8] sm:$0xf] }
  0x15   :  { %v100_v35 = vld [vmem:[#allocation7] sm:$0xf] }
  0x16   :  { %v109_v26 = vld [vmem:[#allocation10] sm:$0xf] }
  0x19   :  { %v168_v5 = vpop.eup %167 }
  0x1a   :  { %v72_v6 = vadd.f32 1.0, %v168_v5  ;;  %v75_v7 = vmul.f32 -0.5, %v168_v5  ;;  %v78_v12 = vand.u32 2147483647, %v168_v5 }
  0x1c   :  { %169 = vrcp.f32 %v72_v6  ;;  %v76_v9 = vadd.f32 1.0, %v75_v7  ;;  %vm79_vm0 = vcmp.lt.f32.partialorder %v78_v12, 0.0004427343  ;;  %v94_v18 = vand.u32 2147483648, %v72_v6 }
  0x1d   :  { %171 = vlog2.f32 %v72_v6  ;;  %vm88_vm1 = vweird.f32 %v72_v6  ;;  %v92_v21 = vand.u32 2147483647, %v72_v6 }
  0x1e   :  { %v77_v14 = vmul.f32 %v168_v5, %v76_v9  ;;  %v95_v25 = vor.u32 1.1754944e-38, %v94_v18 }
  0x1f   :  { %vm93_vm4 = vcmp.eq.f32.partialorder %v92_v21, 8.507059e+37 }
  0x22   :  { %v170_v13 = vpop.eup %169 }
  0x23   :  { %v172_v15 = vpop.eup %171  ;;  %v84_v16 = vmul.f32 %v170_v13, %v72_v6  ;;  %vm89_vm2 = vweird.f32 %v170_v13 }
  0x24   :  { %v74_v19 = vmul.f32 0.6931472, %v172_v15  ;;  %vm90_vm3 = vmor %vm88_vm1, %vm89_vm2 }
  0x25   :  { %v85_v20 = vsub.f32 1.0, %v84_v16 }
  0x26   :  { %v80_v22 = vsel %vm79_vm0, %v77_v14, %v74_v19 }
  0x27   :  { %v86_v23 = vmul.f32 %v170_v13, %v85_v20  ;;  %v81_v24 = vadd.f32 %v80_v22, %v71_v17 }
  0x29   :  { %v87_v27 = vadd.f32 %v170_v13, %v86_v23  ;;  %v108_v28 = vmul.f32 0.5, %v81_v24 }
  0x2b   :  { %v91_v29 = vsel %vm90_vm3, %v170_v13, %v87_v27  ;;  %v110_v30 = vadd.f32 %v109_v26, %v108_v28 }
  0x2c   :  { %v96_v31 = vsel %vm93_vm4, %v95_v25, %v91_v29 }
  0x2d   :  { %v98_v32 = vmul.f32 %v168_v5, %v96_v31  ;;  %111 = vst [vmem:[#allocation10] sm:$0xf] %v110_v30 }
  0x2f   :  { %v99_v33 = vsel %vm97_vm5, %v96_v31, %v98_v32 }
  0x30   :  { %v105_v36 = vadd.f32 %v99_v33, %v64_v8  ;;  %v101_v37 = vmul.f32 %v99_v33, %v64_v8 }
  0x32   :  { %v106_v38 = vadd.f32 %v105_v36, %v104_v34  ;;  %v102_v39 = vadd.f32 %v101_v37, %v100_v35 }
  0x34   :  { %107 = vst [vmem:[#allocation8] sm:$0xf] %v106_v38 }
  0x35   :  { %103 = vst [vmem:[#allocation7] sm:$0xf] %v102_v39  ;;  %133 = dma.vmem_to_hbm [thread:$0]  %s129_s1, 64, %s131_s27, [#allocation9]  }
  0x36   :  { %122 = dma.vmem_to_hbm [thread:$0]  %s118_s29, 64, %s120_s6, [#allocation4]  }
  0x37   :  { %144 = dma.vmem_to_hbm [thread:$0]  %s140_s8, 64, %s142_s11, [#allocation9]  }
  0x38   :  { %297 = dma.done.wait [#allocation4], 64  }
  0x39   :  { %298 = vsyncadd [#allocation4], 4294967232 }
  0x3a   :  { %299 = dma.done.wait [#allocation9], 128  }
  0x3b   :  { %300 = vsyncadd [#allocation9], 4294967168 }
  0x3c   :  { %157 = vsyncpa [#allocation3], 1 }
  0x3d   :  { %158 = vsyncpa [#allocation6], 1 }
  0x3e   :  { %159 = vsyncpa [#allocation4], 1 }
  0x3f   :  { %160 = vsyncpa [#allocation9], 1 }

</bundles_post_ra>
